<compile_context>
chip_gen: v5e
topology: v5e:2x2
jax: 0.10.0
libtpu: 0.0.40
codegen_flags: <defaults>
</compile_context>

<pallas_src>
import jax
import jax.numpy as jnp
import numpy as np
from jax.experimental import pallas as pl
from jax.experimental.pallas import tpu as pltpu

_BIG_NEG = 1e9


# ---------------------------------------------------------------------------
# Tiling / VMEM derivation
# ---------------------------------------------------------------------------
def _derive_batch_tile(B, L1, L2, D, H, N_pad, vmem_budget_bytes):
    """Pick the batch tile BT (and padded batch Bp) for one grid step.

    Constraints / targets:
      * BT == B (single step, full-dim blocks) or BT % 8 == 0 (the (Bp, N_pad)
        output block puts BT on the sublane axis).
      * >= 2 grid steps whenever B > 8, so ("parallel",) can shard the batch
        across v7x's two TensorCores.
      * ~>= 512 flattened rows (BT * max(L)) per step for MXU fill and per-step
        (~0.35 us) overhead amortization, VMEM budget permitting.
    """
    lane = 128

    def est_vmem_bytes(bt):
        bf, f4 = 2, 4
        rnd = lambda n: pl.cdiv(n, lane) * lane
        # streamed blocks (x2: double-buffered by the pipeline)
        stream = bt * (L1 + L2) * rnd(D) * bf          # data1/data2 tiles (bf16)
        stream += bt * (L1 + L2) * lane * f4           # masks: last dim 1 lane-pads to 128
        stream += bt * rnd(N_pad) * f4                 # output tile (f32)
        stream *= 2
        # grid-invariant, single-buffered (pl.Buffered(1)) operands
        const = 2 * (D * rnd(D) * bf + 8 * rnd(D) * f4
                     + D * rnd(H) * bf + 8 * rnd(H) * f4)
        const += D * rnd(N_pad) * bf                   # proj^T
        # rough in-kernel f32 temporaries (hidden activations, scores/exp, pbar*d)
        interm = 2 * bt * (L1 + L2) * rnd(D) * f4 + 3 * bt * (L1 + L2) * rnd(H) * f4
        return stream + const + interm

    if B <= 8:
        bt = B          # single full-batch step; see header note re: tiny B on v7x
    else:
        rows_target = 512
        bt = min(max(rows_target // max(L1, L2), 8), ((B + 15) // 16) * 8)
        bt = max(8, (bt // 8) * 8)
        while bt > 8 and est_vmem_bytes(bt) > vmem_budget_bytes:
            bt -= 8
    bp = pl.cdiv(B, bt) * bt
    return bt, bp, est_vmem_bytes(bt)


# ---------------------------------------------------------------------------
# Kernel
# ---------------------------------------------------------------------------
def _summary(d, m, w1t, b1, w2t, b2):
    """SummaryAttn: softmax(Linear2(ReLU(Linear1(d))) + additive mask) mixed into d.

    d:   (BT, L, D)  features (bf16 or f32)
    m:   (BT, L, 1)  mask (f32, 1 = keep / 0 = drop)
    w1t: (D, D), b1: (1, D) f32, w2t: (D, H), b2: (1, H) f32   (pre-transposed)
    returns (BT, D) f32
    """
    bt, l, dim = d.shape
    h = w2t.shape[-1]
    f32 = jnp.float32

    # Flatten the batch tile into one (BT*L, D) slab -> two big MXU matmuls.
    d2 = d.reshape(bt * l, dim)
    hid = jnp.maximum(jnp.dot(d2, w1t, preferred_element_type=f32) + b1, 0.0)
    s = jnp.dot(hid.astype(w2t.dtype), w2t, preferred_element_type=f32) + b2   # (BT*L, H)

    # Additive masking in f32.  Fully-masked rows degenerate to a softmax of the
    # raw scores instead of an exactly-uniform one; no such rows occur here.
    s = s.reshape(bt, l, h) + (m - 1.0) * _BIG_NEG                              # (BT, L, H)

    # Softmax over L (per batch element, per head), all in f32.
    s = s - jnp.max(s, axis=1, keepdims=True)
    p = jnp.exp(s)
    p = p * pl.reciprocal(jnp.sum(p, axis=1, keepdims=True), approx=False)

    # TODO(synk): attention dropout (p=0.1) omitted -- eval/inference semantics.
    # TODO(synk): for L >= 128, transpose scores to (BT*H, L) for a lane-dense
    # softmax (one XLU transpose per tile); not worth it at the toy L here.

    # mean_h(attn^T @ d) == (mean_h attn)^T @ d: collapse heads first, then a
    # single broadcast-multiply + sublane reduction replaces the batched matmul.
    pbar = jnp.sum(p, axis=-1, keepdims=True) * (1.0 / h)                       # (BT, L, 1)
    return jnp.sum(pbar * d.astype(f32), axis=1)                                # (BT, D)


def _inner_pred_kernel(d1_ref, m1_ref, d2_ref, m2_ref,
                       w1a_ref, b1a_ref, w2a_ref, b2a_ref,
                       w1b_ref, b1b_ref, w2b_ref, b2b_ref,
                       projT_ref, out_ref):
    wt1 = _summary(d1_ref[...], m1_ref[...], w1a_ref[...], b1a_ref[...],
                   w2a_ref[...], b2a_ref[...])
    wt2 = _summary(d2_ref[...], m2_ref[...], w1b_ref[...], b1b_ref[...],
                   w2b_ref[...], b2b_ref[...])
    weighted = wt1 * wt2                                   # 'ans_prod_attn' combine, (BT, D)
    out_ref[...] = jnp.dot(weighted.astype(projT_ref.dtype), projT_ref[...],
                           preferred_element_type=jnp.float32)                  # (BT, N_pad)


# ---------------------------------------------------------------------------
# Wrapper
# ---------------------------------------------------------------------------
def inner_prediction_layer(data1, data2, vec, mask1, mask2, params, *,
                           compute_dtype=jnp.bfloat16,
                           vmem_budget_bytes=48 * 1024 * 1024):
    B, L1, D = data1.shape
    _, L2, _ = data2.shape
    N = vec.shape[0]
    H = params["w2_0"].shape[0]
    hidden = params["w_lin"].shape[0]          # == D for ans_prod_attn / is_cat=False
    f32, cdt = jnp.float32, compute_dtype

    # Batch-invariant answer projection in plain XLA (no extra kernel launch,
    # no HBM intermediate round-trip); pre-transposed to (D, N) and lane-padded
    # to a multiple of 128 so the kernel's output store is a full unmasked vst.
    projT = (vec.astype(f32) @ params["w_lin"].astype(f32).T).T                  # (hidden, N)
    N_pad = pl.cdiv(N, 128) * 128
    projT = jnp.pad(projT, ((0, 0), (0, N_pad - N))).astype(cdt)

    # Pad L to a multiple of the sublane tile (16 for bf16, 8 for f32) so the
    # in-kernel (BT*L, D) reshape is a free view (no tile-crossing relayout).
    # Padded rows carry mask = 0 -> additive -1e9 -> exactly zero attn weight.
    lmul = 16 if jnp.dtype(cdt).itemsize < 4 else 8
    L1p = pl.cdiv(L1, lmul) * lmul
    L2p = pl.cdiv(L2, lmul) * lmul
    d1 = jnp.pad(data1, ((0, 0), (0, L1p - L1), (0, 0))).astype(cdt)
    d2 = jnp.pad(data2, ((0, 0), (0, L2p - L2), (0, 0))).astype(cdt)
    m1 = jnp.pad(mask1.astype(f32), ((0, 0), (0, L1p - L1)))[:, :, None]
    m2 = jnp.pad(mask2.astype(f32), ((0, 0), (0, L2p - L2)))[:, :, None]

    # Batch tile / grid / VMEM limit derived per call (not a fixed BT).
    BT, Bp, est = _derive_batch_tile(B, L1p, L2p, D, H, N_pad, vmem_budget_bytes)
    if Bp != B:
        bpad = ((0, Bp - B), (0, 0), (0, 0))
        d1, d2 = jnp.pad(d1, bpad), jnp.pad(d2, bpad)
        m1, m2 = jnp.pad(m1, bpad), jnp.pad(m2, bpad)     # padded rows: mask 0, data 0
    grid = (Bp // BT,)
    vmem_limit = int(min(max(int(1.3 * est), 32 * 1024 * 1024),
                         int(1.3 * vmem_budget_bytes)))

    # Grid-invariant operands: single pipeline buffer (their block index never
    # changes; a second buffer is pure VMEM waste -- proj^T is the biggest one).
    single = dict(pipeline_mode=pl.Buffered(1))

    out = pl.pallas_call(
        _inner_pred_kernel,
        out_shape=jax.ShapeDtypeStruct((Bp, N_pad), f32),
        grid=grid,
        in_specs=[
            pl.BlockSpec((BT, L1p, D), lambda i: (i, 0, 0)),            # data1 tile (bf16)
            pl.BlockSpec((BT, L1p, 1), lambda i: (i, 0, 0)),            # mask1 (f32)
            pl.BlockSpec((BT, L2p, D), lambda i: (i, 0, 0)),            # data2 tile (bf16)
            pl.BlockSpec((BT, L2p, 1), lambda i: (i, 0, 0)),            # mask2 (f32)
            pl.BlockSpec((D, D), lambda i: (0, 0), **single),           # summary0 W1^T
            pl.BlockSpec((1, D), lambda i: (0, 0), **single),           # summary0 b1
            pl.BlockSpec((D, H), lambda i: (0, 0), **single),           # summary0 W2^T
            pl.BlockSpec((1, H), lambda i: (0, 0), **single),           # summary0 b2
            pl.BlockSpec((D, D), lambda i: (0, 0), **single),           # summary1 W1^T
            pl.BlockSpec((1, D), lambda i: (0, 0), **single),           # summary1 b1
            pl.BlockSpec((D, H), lambda i: (0, 0), **single),           # summary1 W2^T
            pl.BlockSpec((1, H), lambda i: (0, 0), **single),           # summary1 b2
            pl.BlockSpec((hidden, N_pad), lambda i: (0, 0), **single),  # proj^T (padded)
        ],
        out_specs=pl.BlockSpec((BT, N_pad), lambda i: (i, 0)),
        compiler_params=pltpu.CompilerParams(
            dimension_semantics=("parallel",),
            vmem_limit_bytes=vmem_limit),
    )(d1, m1, d2, m2,
      params["w1_0"].T.astype(cdt), params["b1_0"].astype(f32),
      params["w2_0"].T.astype(cdt), params["b2_0"].astype(f32),
      params["w1_1"].T.astype(cdt), params["b1_1"].astype(f32),
      params["w2_1"].T.astype(cdt), params["b2_1"].astype(f32),
      projT)
    return out[:B, :N]                                    # (B, N_ans)


# ---------------------------------------------------------------------------
# Pure-JAX reference (mirrors the PyTorch forward in eval mode, f32 end to end)
# ---------------------------------------------------------------------------
def _reference(data1, data2, vec, mask1, mask2, params):
    def summary(d, m, w1, b1, w2, b2):
        h = jnp.maximum(d @ w1.T + b1, 0.0)
        s = h @ w2.T + b2                                   # (B, L, H)
        s = jnp.where(m[:, :, None] == 0.0, -1e9, s)
        s = s - jnp.max(s, axis=1, keepdims=True)
        p = jnp.exp(s)
        p = p / jnp.sum(p, axis=1, keepdims=True)
        w = jnp.einsum("blh,bld->bhd", p, d)
        return w.mean(axis=1)                               # (B, D)

    wt1 = summary(data1, mask1.astype(jnp.float32),
                  params["w1_0"], params["b1_0"], params["w2_0"], params["b2_0"])
    wt2 = summary(data2, mask2.astype(jnp.float32),
                  params["w1_1"], params["b1_1"], params["w2_1"], params["b2_1"])
    weighted = wt1 * wt2
    proj = vec @ params["w_lin"].T
    return weighted @ proj.T


# ---------------------------------------------------------------------------
# Main
# ---------------------------------------------------------------------------
if __name__ == "__main__":
    B, L1, L2 = 2, 16, 8           # batch, image regions, question length
    D, H = 32, 2                   # dim, num_attn
    DIM_VEC, N_ANS = 32, 16        # answer-embedding dim, number of candidate answers

    key = jax.random.PRNGKey(0)
    keys = jax.random.split(key, 16)

    data1 = jax.random.normal(keys[0], (B, L1, D), jnp.float32)
    data2 = jax.random.normal(keys[1], (B, L2, D), jnp.float32)
    vec = jax.random.normal(keys[2], (N_ANS, DIM_VEC), jnp.float32)
    mask1 = jnp.ones((B, L1), jnp.float32)
    mask2 = jnp.ones((B, L2), jnp.float32).at[1, L2 - 2:].set(0.0)  # padded question tail

    def init(k, shape, scale=0.05):
        return scale * jax.random.normal(k, shape, jnp.float32)

    params = {
        # SummaryAttn 0: Linear(D, D) -> ReLU -> Linear(D, H)
        "w1_0": init(keys[3], (D, D)), "b1_0": init(keys[4], (1, D)),
        "w2_0": init(keys[5], (H, D)), "b2_0": init(keys[6], (1, H)),
        # SummaryAttn 1
        "w1_1": init(keys[7], (D, D)), "b1_1": init(keys[8], (1, D)),
        "w2_1": init(keys[9], (H, D)), "b2_1": init(keys[10], (1, H)),
        # self.linear: nn.Linear(dim_vec, hidden_size=D, bias=False)
        "w_lin": init(keys[11], (D, DIM_VEC)),
    }

    out = inner_prediction_layer(data1, data2, vec, mask1, mask2, params)
    out = jax.block_until_ready(out)

    ref = _reference(data1, data2, vec, mask1, mask2, params)
    assert out.shape == (B, N_ANS), out.shape
    # bf16 MXU operands (data / weights / proj^T plus the in-kernel hid/weighted
    # casts) vs. the f32 reference -> tolerance sized for bf16 rounding; the
    # softmax and all accumulations stay f32 in the kernel.
    assert np.allclose(np.asarray(out), np.asarray(ref), rtol=3e-2, atol=4e-3), (
        "mismatch vs reference")
    print("KERNEL_OK")
</pallas_src>

<mosaic_0001>
module attributes {stable_mosaic.version = 11 : i64} {
  func.func @_inner_pred_kernel(%arg0: i32, %arg1: memref<2x16x32xbf16, #tpu.memory_space<vmem>>, %arg2: memref<2x16x1xf32, #tpu.memory_space<vmem>>, %arg3: memref<2x16x32xbf16, #tpu.memory_space<vmem>>, %arg4: memref<2x16x1xf32, #tpu.memory_space<vmem>>, %arg5: memref<32x32xbf16, #tpu.memory_space<vmem>>, %arg6: memref<1x32xf32, #tpu.memory_space<vmem>>, %arg7: memref<32x2xbf16, #tpu.memory_space<vmem>>, %arg8: memref<1x2xf32, #tpu.memory_space<vmem>>, %arg9: memref<32x32xbf16, #tpu.memory_space<vmem>>, %arg10: memref<1x32xf32, #tpu.memory_space<vmem>>, %arg11: memref<32x2xbf16, #tpu.memory_space<vmem>>, %arg12: memref<1x2xf32, #tpu.memory_space<vmem>>, %arg13: memref<32x128xbf16, #tpu.memory_space<vmem>>, %arg14: memref<2x128xf32, #tpu.memory_space<vmem>>) attributes {dimension_semantics = [#tpu.dimension_semantics<parallel>], iteration_bounds = array<i64: 1>, scalar_prefetch = 0 : i64, scratch_operands = 0 : i64, tpu.core_type = #tpu.core_type<tc>, window_params = [{transform_indices = @transform_0, window_bounds = array<i64: 2, 16, 32>}, {transform_indices = @transform_1, window_bounds = array<i64: 2, 16, 1>}, {transform_indices = @transform_2, window_bounds = array<i64: 2, 16, 32>}, {transform_indices = @transform_3, window_bounds = array<i64: 2, 16, 1>}, {pipeline_mode = #tpu.pipeline_mode<synchronous>, transform_indices = @transform_4, window_bounds = array<i64: 32, 32>}, {pipeline_mode = #tpu.pipeline_mode<synchronous>, transform_indices = @transform_5, window_bounds = array<i64: 1, 32>}, {pipeline_mode = #tpu.pipeline_mode<synchronous>, transform_indices = @transform_6, window_bounds = array<i64: 32, 2>}, {pipeline_mode = #tpu.pipeline_mode<synchronous>, transform_indices = @transform_7, window_bounds = array<i64: 1, 2>}, {pipeline_mode = #tpu.pipeline_mode<synchronous>, transform_indices = @transform_8, window_bounds = array<i64: 32, 32>}, {pipeline_mode = #tpu.pipeline_mode<synchronous>, transform_indices = @transform_9, window_bounds = array<i64: 1, 32>}, {pipeline_mode = #tpu.pipeline_mode<synchronous>, transform_indices = @transform_10, window_bounds = array<i64: 32, 2>}, {pipeline_mode = #tpu.pipeline_mode<synchronous>, transform_indices = @transform_11, window_bounds = array<i64: 1, 2>}, {pipeline_mode = #tpu.pipeline_mode<synchronous>, transform_indices = @transform_12, window_bounds = array<i64: 32, 128>}, {transform_indices = @transform_13, window_bounds = array<i64: 2, 128>}]} {
    %c0 = arith.constant 0 : index
    %c0_0 = arith.constant 0 : index
    %c0_1 = arith.constant 0 : index
    %0 = vector.load %arg1[%c0, %c0_0, %c0_1] : memref<2x16x32xbf16, #tpu.memory_space<vmem>>, vector<2x16x32xbf16>
    %c0_2 = arith.constant 0 : index
    %c0_3 = arith.constant 0 : index
    %c0_4 = arith.constant 0 : index
    %1 = vector.load %arg2[%c0_2, %c0_3, %c0_4] : memref<2x16x1xf32, #tpu.memory_space<vmem>>, vector<2x16x1xf32>
    %c0_5 = arith.constant 0 : index
    %c0_6 = arith.constant 0 : index
    %2 = vector.load %arg5[%c0_5, %c0_6] : memref<32x32xbf16, #tpu.memory_space<vmem>>, vector<32x32xbf16>
    %c0_7 = arith.constant 0 : index
    %c0_8 = arith.constant 0 : index
    %3 = vector.load %arg6[%c0_7, %c0_8] : memref<1x32xf32, #tpu.memory_space<vmem>>, vector<1x32xf32>
    %c0_9 = arith.constant 0 : index
    %c0_10 = arith.constant 0 : index
    %4 = vector.load %arg7[%c0_9, %c0_10] : memref<32x2xbf16, #tpu.memory_space<vmem>>, vector<32x2xbf16>
    %c0_11 = arith.constant 0 : index
    %c0_12 = arith.constant 0 : index
    %5 = vector.load %arg8[%c0_11, %c0_12] : memref<1x2xf32, #tpu.memory_space<vmem>>, vector<1x2xf32>
    %6 = vector.shape_cast %0 : vector<2x16x32xbf16> to vector<32x32xbf16>
    %cst = arith.constant dense<0.000000e+00> : vector<32x32xf32>
    %7 = tpu.matmul %6, %2, %cst {dimension_numbers = #tpu.dot_dimension_numbers<[1], [0], [0], [1], [0, 0, 1, 1], [], []>} : vector<32x32xbf16>, vector<32x32xbf16>, vector<32x32xf32> -> vector<32x32xf32>
    %8 = vector.broadcast %3 : vector<1x32xf32> to vector<32x32xf32>
    %9 = arith.addf %7, %8 : vector<32x32xf32>
    %cst_13 = arith.constant 0.000000e+00 : f32
    %10 = vector.broadcast %cst_13 : f32 to vector<32x32xf32>
    %11 = arith.maximumf %9, %10 : vector<32x32xf32>
    %12 = arith.truncf %11 : vector<32x32xf32> to vector<32x32xbf16>
    %cst_14 = arith.constant dense<0.000000e+00> : vector<32x2xf32>
    %13 = tpu.matmul %12, %4, %cst_14 {dimension_numbers = #tpu.dot_dimension_numbers<[1], [0], [0], [1], [0, 0, 1, 1], [], []>} : vector<32x32xbf16>, vector<32x2xbf16>, vector<32x2xf32> -> vector<32x2xf32>
    %14 = vector.broadcast %5 : vector<1x2xf32> to vector<32x2xf32>
    %15 = arith.addf %13, %14 : vector<32x2xf32>
    %16 = vector.shape_cast %15 : vector<32x2xf32> to vector<2x16x2xf32>
    %cst_15 = arith.constant 1.000000e+00 : f32
    %17 = vector.broadcast %cst_15 : f32 to vector<2x16x1xf32>
    %18 = arith.subf %1, %17 : vector<2x16x1xf32>
    %cst_16 = arith.constant 1.000000e+09 : f32
    %19 = vector.broadcast %cst_16 : f32 to vector<2x16x1xf32>
    %20 = arith.mulf %18, %19 : vector<2x16x1xf32>
    %21 = vector.broadcast %20 : vector<2x16x1xf32> to vector<2x16x2xf32>
    %22 = arith.addf %16, %21 : vector<2x16x2xf32>
    %cst_17 = arith.constant dense<0xFF800000> : vector<2x2xf32>
    %23 = vector.multi_reduction <maximumf>, %22, %cst_17 [1] : vector<2x16x2xf32> to vector<2x2xf32>
    %24 = vector.shape_cast %23 : vector<2x2xf32> to vector<2x1x2xf32>
    %25 = vector.broadcast %24 : vector<2x1x2xf32> to vector<2x16x2xf32>
    %26 = arith.subf %22, %25 : vector<2x16x2xf32>
    %27 = math.exp %26 : vector<2x16x2xf32>
    %cst_18 = arith.constant dense<0.000000e+00> : vector<2x2xf32>
    %28 = vector.multi_reduction <add>, %27, %cst_18 [1] : vector<2x16x2xf32> to vector<2x2xf32>
    %29 = vector.shape_cast %28 : vector<2x2xf32> to vector<2x1x2xf32>
    %30 = tpu.reciprocal %29 : vector<2x1x2xf32> -> vector<2x1x2xf32>
    %31 = vector.broadcast %30 : vector<2x1x2xf32> to vector<2x16x2xf32>
    %32 = arith.mulf %27, %31 : vector<2x16x2xf32>
    %cst_19 = arith.constant dense<0.000000e+00> : vector<2x16xf32>
    %33 = vector.multi_reduction <add>, %32, %cst_19 [2] : vector<2x16x2xf32> to vector<2x16xf32>
    %34 = vector.shape_cast %33 : vector<2x16xf32> to vector<2x16x1xf32>
    %cst_20 = arith.constant 5.000000e-01 : f32
    %35 = vector.broadcast %cst_20 : f32 to vector<2x16x1xf32>
    %36 = arith.mulf %34, %35 : vector<2x16x1xf32>
    %37 = arith.extf %0 : vector<2x16x32xbf16> to vector<2x16x32xf32>
    %38 = vector.broadcast %36 : vector<2x16x1xf32> to vector<2x16x32xf32>
    %39 = arith.mulf %38, %37 : vector<2x16x32xf32>
    %cst_21 = arith.constant dense<0.000000e+00> : vector<2x32xf32>
    %40 = vector.multi_reduction <add>, %39, %cst_21 [1] : vector<2x16x32xf32> to vector<2x32xf32>
    %c0_22 = arith.constant 0 : index
    %c0_23 = arith.constant 0 : index
    %c0_24 = arith.constant 0 : index
    %41 = vector.load %arg3[%c0_22, %c0_23, %c0_24] : memref<2x16x32xbf16, #tpu.memory_space<vmem>>, vector<2x16x32xbf16>
    %c0_25 = arith.constant 0 : index
    %c0_26 = arith.constant 0 : index
    %c0_27 = arith.constant 0 : index
    %42 = vector.load %arg4[%c0_25, %c0_26, %c0_27] : memref<2x16x1xf32, #tpu.memory_space<vmem>>, vector<2x16x1xf32>
    %c0_28 = arith.constant 0 : index
    %c0_29 = arith.constant 0 : index
    %43 = vector.load %arg9[%c0_28, %c0_29] : memref<32x32xbf16, #tpu.memory_space<vmem>>, vector<32x32xbf16>
    %c0_30 = arith.constant 0 : index
    %c0_31 = arith.constant 0 : index
    %44 = vector.load %arg10[%c0_30, %c0_31] : memref<1x32xf32, #tpu.memory_space<vmem>>, vector<1x32xf32>
    %c0_32 = arith.constant 0 : index
    %c0_33 = arith.constant 0 : index
    %45 = vector.load %arg11[%c0_32, %c0_33] : memref<32x2xbf16, #tpu.memory_space<vmem>>, vector<32x2xbf16>
    %c0_34 = arith.constant 0 : index
    %c0_35 = arith.constant 0 : index
    %46 = vector.load %arg12[%c0_34, %c0_35] : memref<1x2xf32, #tpu.memory_space<vmem>>, vector<1x2xf32>
    %47 = vector.shape_cast %41 : vector<2x16x32xbf16> to vector<32x32xbf16>
    %cst_36 = arith.constant dense<0.000000e+00> : vector<32x32xf32>
    %48 = tpu.matmul %47, %43, %cst_36 {dimension_numbers = #tpu.dot_dimension_numbers<[1], [0], [0], [1], [0, 0, 1, 1], [], []>} : vector<32x32xbf16>, vector<32x32xbf16>, vector<32x32xf32> -> vector<32x32xf32>
    %49 = vector.broadcast %44 : vector<1x32xf32> to vector<32x32xf32>
    %50 = arith.addf %48, %49 : vector<32x32xf32>
    %cst_37 = arith.constant 0.000000e+00 : f32
    %51 = vector.broadcast %cst_37 : f32 to vector<32x32xf32>
    %52 = arith.maximumf %50, %51 : vector<32x32xf32>
    %53 = arith.truncf %52 : vector<32x32xf32> to vector<32x32xbf16>
    %cst_38 = arith.constant dense<0.000000e+00> : vector<32x2xf32>
    %54 = tpu.matmul %53, %45, %cst_38 {dimension_numbers = #tpu.dot_dimension_numbers<[1], [0], [0], [1], [0, 0, 1, 1], [], []>} : vector<32x32xbf16>, vector<32x2xbf16>, vector<32x2xf32> -> vector<32x2xf32>
    %55 = vector.broadcast %46 : vector<1x2xf32> to vector<32x2xf32>
    %56 = arith.addf %54, %55 : vector<32x2xf32>
    %57 = vector.shape_cast %56 : vector<32x2xf32> to vector<2x16x2xf32>
    %cst_39 = arith.constant 1.000000e+00 : f32
    %58 = vector.broadcast %cst_39 : f32 to vector<2x16x1xf32>
    %59 = arith.subf %42, %58 : vector<2x16x1xf32>
    %cst_40 = arith.constant 1.000000e+09 : f32
    %60 = vector.broadcast %cst_40 : f32 to vector<2x16x1xf32>
    %61 = arith.mulf %59, %60 : vector<2x16x1xf32>
    %62 = vector.broadcast %61 : vector<2x16x1xf32> to vector<2x16x2xf32>
    %63 = arith.addf %57, %62 : vector<2x16x2xf32>
    %cst_41 = arith.constant dense<0xFF800000> : vector<2x2xf32>
    %64 = vector.multi_reduction <maximumf>, %63, %cst_41 [1] : vector<2x16x2xf32> to vector<2x2xf32>
    %65 = vector.shape_cast %64 : vector<2x2xf32> to vector<2x1x2xf32>
    %66 = vector.broadcast %65 : vector<2x1x2xf32> to vector<2x16x2xf32>
    %67 = arith.subf %63, %66 : vector<2x16x2xf32>
    %68 = math.exp %67 : vector<2x16x2xf32>
    %cst_42 = arith.constant dense<0.000000e+00> : vector<2x2xf32>
    %69 = vector.multi_reduction <add>, %68, %cst_42 [1] : vector<2x16x2xf32> to vector<2x2xf32>
    %70 = vector.shape_cast %69 : vector<2x2xf32> to vector<2x1x2xf32>
    %71 = tpu.reciprocal %70 : vector<2x1x2xf32> -> vector<2x1x2xf32>
    %72 = vector.broadcast %71 : vector<2x1x2xf32> to vector<2x16x2xf32>
    %73 = arith.mulf %68, %72 : vector<2x16x2xf32>
    %cst_43 = arith.constant dense<0.000000e+00> : vector<2x16xf32>
    %74 = vector.multi_reduction <add>, %73, %cst_43 [2] : vector<2x16x2xf32> to vector<2x16xf32>
    %75 = vector.shape_cast %74 : vector<2x16xf32> to vector<2x16x1xf32>
    %cst_44 = arith.constant 5.000000e-01 : f32
    %76 = vector.broadcast %cst_44 : f32 to vector<2x16x1xf32>
    %77 = arith.mulf %75, %76 : vector<2x16x1xf32>
    %78 = arith.extf %41 : vector<2x16x32xbf16> to vector<2x16x32xf32>
    %79 = vector.broadcast %77 : vector<2x16x1xf32> to vector<2x16x32xf32>
    %80 = arith.mulf %79, %78 : vector<2x16x32xf32>
    %cst_45 = arith.constant dense<0.000000e+00> : vector<2x32xf32>
    %81 = vector.multi_reduction <add>, %80, %cst_45 [1] : vector<2x16x32xf32> to vector<2x32xf32>
    %82 = arith.mulf %40, %81 : vector<2x32xf32>
    %83 = arith.truncf %82 : vector<2x32xf32> to vector<2x32xbf16>
    %c0_46 = arith.constant 0 : index
    %c0_47 = arith.constant 0 : index
    %84 = vector.load %arg13[%c0_46, %c0_47] : memref<32x128xbf16, #tpu.memory_space<vmem>>, vector<32x128xbf16>
    %cst_48 = arith.constant dense<0.000000e+00> : vector<2x128xf32>
    %85 = tpu.matmul %83, %84, %cst_48 {dimension_numbers = #tpu.dot_dimension_numbers<[1], [0], [0], [1], [0, 0, 1, 1], [], []>} : vector<2x32xbf16>, vector<32x128xbf16>, vector<2x128xf32> -> vector<2x128xf32>
    %c0_49 = arith.constant 0 : index
    %c0_50 = arith.constant 0 : index
    %86 = vector.load %arg14[%c0_49, %c0_50] : memref<2x128xf32, #tpu.memory_space<vmem>>, vector<2x128xf32>
    tpu.vector_store %arg14[%c0_49, %c0_50], %85 {strides = array<i32>} : memref<2x128xf32, #tpu.memory_space<vmem>>, vector<2x128xf32>,
    return
  }
  func.func @transform_0(%arg0: i32) -> (i32, i32, i32) {
    %c0_i32 = arith.constant 0 : i32
    %c0_i32_0 = arith.constant 0 : i32
    %c0_i32_1 = arith.constant 0 : i32
    return %arg0, %c0_i32, %c0_i32_0 : i32, i32, i32
  }
  func.func @transform_1(%arg0: i32) -> (i32, i32, i32) {
    %c0_i32 = arith.constant 0 : i32
    %c0_i32_0 = arith.constant 0 : i32
    %c0_i32_1 = arith.constant 0 : i32
    return %arg0, %c0_i32, %c0_i32_0 : i32, i32, i32
  }
  func.func @transform_2(%arg0: i32) -> (i32, i32, i32) {
    %c0_i32 = arith.constant 0 : i32
    %c0_i32_0 = arith.constant 0 : i32
    %c0_i32_1 = arith.constant 0 : i32
    return %arg0, %c0_i32, %c0_i32_0 : i32, i32, i32
  }
  func.func @transform_3(%arg0: i32) -> (i32, i32, i32) {
    %c0_i32 = arith.constant 0 : i32
    %c0_i32_0 = arith.constant 0 : i32
    %c0_i32_1 = arith.constant 0 : i32
    return %arg0, %c0_i32, %c0_i32_0 : i32, i32, i32
  }
  func.func @transform_4(%arg0: i32) -> (i32, i32) {
    %c0_i32 = arith.constant 0 : i32
    %c0_i32_0 = arith.constant 0 : i32
    %c0_i32_1 = arith.constant 0 : i32
    return %c0_i32, %c0_i32_0 : i32, i32
  }
  func.func @transform_5(%arg0: i32) -> (i32, i32) {
    %c0_i32 = arith.constant 0 : i32
    %c0_i32_0 = arith.constant 0 : i32
    %c0_i32_1 = arith.constant 0 : i32
    return %c0_i32, %c0_i32_0 : i32, i32
  }
  func.func @transform_6(%arg0: i32) -> (i32, i32) {
    %c0_i32 = arith.constant 0 : i32
    %c0_i32_0 = arith.constant 0 : i32
    %c0_i32_1 = arith.constant 0 : i32
    return %c0_i32, %c0_i32_0 : i32, i32
  }
  func.func @transform_7(%arg0: i32) -> (i32, i32) {
    %c0_i32 = arith.constant 0 : i32
    %c0_i32_0 = arith.constant 0 : i32
    %c0_i32_1 = arith.constant 0 : i32
    return %c0_i32, %c0_i32_0 : i32, i32
  }
  func.func @transform_8(%arg0: i32) -> (i32, i32) {
    %c0_i32 = arith.constant 0 : i32
    %c0_i32_0 = arith.constant 0 : i32
    %c0_i32_1 = arith.constant 0 : i32
    return %c0_i32, %c0_i32_0 : i32, i32
  }
  func.func @transform_9(%arg0: i32) -> (i32, i32) {
    %c0_i32 = arith.constant 0 : i32
    %c0_i32_0 = arith.constant 0 : i32
    %c0_i32_1 = arith.constant 0 : i32
    return %c0_i32, %c0_i32_0 : i32, i32
  }
  func.func @transform_10(%arg0: i32) -> (i32, i32) {
    %c0_i32 = arith.constant 0 : i32
    %c0_i32_0 = arith.constant 0 : i32
    %c0_i32_1 = arith.constant 0 : i32
    return %c0_i32, %c0_i32_0 : i32, i32
  }
  func.func @transform_11(%arg0: i32) -> (i32, i32) {
    %c0_i32 = arith.constant 0 : i32
    %c0_i32_0 = arith.constant 0 : i32
    %c0_i32_1 = arith.constant 0 : i32
    return %c0_i32, %c0_i32_0 : i32, i32
  }
  func.func @transform_12(%arg0: i32) -> (i32, i32) {
    %c0_i32 = arith.constant 0 : i32
    %c0_i32_0 = arith.constant 0 : i32
    %c0_i32_1 = arith.constant 0 : i32
    return %c0_i32, %c0_i32_0 : i32, i32
  }
  func.func @transform_13(%arg0: i32) -> (i32, i32) {
    %c0_i32 = arith.constant 0 : i32
    %c0_i32_0 = arith.constant 0 : i32
    return %arg0, %c0_i32 : i32, i32
  }
}

</mosaic_0001>

<bundles_post_ra>
// kernel: tpu_custom_call.1
= control target key start
LH: loop header
LB: loop body
LE: loop exit
PB: predicated region body
PF: predicated region fallthrough
CT: control target
= control target key end

     0   :  { %s1034_s0 = inlined_call_operand.vmem [shape: bf16[2,16,32], index: 0, kind: input, shape index: {}]   ;;  %s1035_s1 = inlined_call_operand.vmem [shape: f32[2,16,1], index: 1, kind: input, shape index: {}]   ;;  %s1036_s2 = inlined_call_operand.vmem [shape: bf16[2,16,32], index: 2, kind: input, shape index: {}]   ;;  %s1037_s3 = inlined_call_operand.vmem [shape: f32[2,16,1], index: 3, kind: input, shape index: {}]   ;;  %s1038_s4 = inlined_call_operand.vmem [shape: bf16[32,32], index: 4, kind: input, shape index: {}]   ;;  %s1039_s5 = inlined_call_operand.vmem [shape: f32[1,32], index: 5, kind: input, shape index: {}]   ;;  %s1040_s6 = inlined_call_operand.vmem [shape: bf16[32,2], index: 6, kind: input, shape index: {}]   ;;  %s1041_s7 = inlined_call_operand.vmem [shape: f32[1,2], index: 7, kind: input, shape index: {}]   ;;  %s1042_s8 = inlined_call_operand.vmem [shape: bf16[32,32], index: 8, kind: input, shape index: {}]   ;;  %s1043_s9 = inlined_call_operand.vmem [shape: f32[1,32], index: 9, kind: input, shape index: {}]   ;;  %s1044_s10 = inlined_call_operand.vmem [shape: bf16[32,2], index: 10, kind: input, shape index: {}]   ;;  %s1045_s11 = inlined_call_operand.vmem [shape: f32[1,2], index: 11, kind: input, shape index: {}]   ;;  %s1046_s12 = inlined_call_operand.vmem [shape: bf16[32,128], index: 12, kind: input, shape index: {}]   ;;  %s1047_s13 = inlined_call_operand.hbm [shape: f32[2,128], index: 13, kind: output, shape index: {}]  }
   0x1   :  { %v720_v0 = vld [vmem:[%s1038_s4 + $0x8] sm:$0xff]  ;;  %v719_v2 = vld [vmem:[%s1038_s4] sm:$0xff] }
   0x2   :  { %v726_v1 = vld [vmem:[%s1042_s8 + $0x8] sm:$0xff]  ;;  %102 = vmatpush.bf16.msra.mxu0 %v720_v0  ;;  %v725_v3 = vld [vmem:[%s1042_s8] sm:$0xff] }
   0x3   :  { %371 = vmatpush.bf16.msra.mxu2 %v726_v1 }
   0x4   :  { %18 = vsyncpa [#allocation3], 0  ;;  %v717_v4 = vld [vmem:[%s1034_s0] sm:$0xff]  ;;  %vm89_vm0 = vcmask 261120   ;;  %v718_v6 = vld [vmem:[%s1034_s0 + $0x8] sm:$0xff]  ;;  %v790_v14 = vmov 0  }
   0x5   :  { %v723_v5 = vld [vmem:[%s1036_s2] sm:$0xff]  ;;  %v724_v7 = vld [vmem:[%s1036_s2 + $0x8] sm:$0xff]  ;;  %733 = vset.pattern.permute.xlu0 %v790_v14  ;;  %734 = vset.pattern.permute.xlu1 %v790_v14  ;;  %v52_v19 = vld [vmem:[%s1035_s1 + $0x10] sm:$0xff]  ;;  %vm193_vm1 = vcmask 15360   ;;  %s635_s23 = sshll.u32 %s1047_s13, 4  ;;  %s636_s23 = int_to_ptr.hbm [resolvable:$true] %s635_s23 }
   0x6   :  { %103 = vmatpush.bf16.msra.mxu0 %v719_v2  ;;  %v722_v8 = vld [vmem:[%s1040_s6 + $0x8] sm:$0xff]  ;;  %v721_v9 = vld [vmem:[%s1040_s6] sm:$0xff]  ;;  %735 = vset.pattern.permute.xlu2 %v790_v14  ;;  %v322_v20 = vld [vmem:[%s1037_s3 + $0x10] sm:$0xff]  ;;  %v674_v21 = vadd.f32 -1.0, %v52_v19 }
   0x7   :  { %372 = vmatpush.bf16.msra.mxu2 %v725_v3  ;;  %148 = vmatpush.bf16.msra.mxu1 %v722_v8  ;;  %v50_v10 = vld [vmem:[%s1035_s1] sm:$0xff]  ;;  %v728_v11 = vld [vmem:[%s1044_s10 + $0x8] sm:$0xff]  ;;  %v706_v22 = vadd.f32 -1.0, %v322_v20  ;;  %v53_v27 = vld [vmem:[%s1035_s1 + $0x18] sm:$0xff] }
   0x8   :  { %v672_v12 = vadd.f32 -1.0, %v50_v10  ;;  %417 = vmatpush.bf16.msra.mxu3 %v728_v11  ;;  %v727_v15 = vld [vmem:[%s1044_s10] sm:$0xff]  ;;  %v51_v16 = vld [vmem:[%s1035_s1 + $0x8] sm:$0xff]  ;;  %v167_v23 = vmul.f32 1e+09, %v674_v21  ;;  %v675_v28 = vadd.f32 -1.0, %v53_v27 }
   0x9   :  { %660 = vmatmul.msk.bf16.vlgmr.msra.gmra.mxu0 %vm89_vm0, %v717_v4  ;;  %v673_v17 = vadd.f32 -1.0, %v51_v16  ;;  %v436_v24 = vmul.f32 1e+09, %v706_v22  ;;  %v736_v26 = vld [vmem:[%s1039_s5] ss:$0 sm:$0xff]  ;;  %v323_v29 = vld [vmem:[%s1037_s3 + $0x18] sm:$0xff] }
   0xa   :  { %692 = vmatmul.msk.bf16.vlgmr.msra.gmra.mxu2 %vm89_vm0, %v723_v5  ;;  %v165_v13 = vmul.f32 1e+09, %v672_v12  ;;  %181 = vperm.xlu1 %734, %v167_v23   ;;  %v320_v30 = vld [vmem:[%s1037_s3] sm:$0xff]  ;;  %v168_v32 = vmul.f32 1e+09, %v675_v28  ;;  %v321_v35 = vld [vmem:[%s1037_s3 + $0x8] sm:$0xff] }
   0xb   :  { %149 = vmatpush.bf16.msra.mxu1 %v721_v9  ;;  %v166_v18 = vmul.f32 1e+09, %v673_v17  ;;  %v704_v33 = vadd.f32 -1.0, %v320_v30  ;;  %v707_v37 = vadd.f32 -1.0, %v323_v29  ;;  %v737_v39 = vld [vmem:[%s1043_s9] ss:$0 sm:$0xff] }
   0xc   :  { %171 = vperm.xlu0 %733, %v165_v13   ;;  %418 = vmatpush.bf16.msra.mxu3 %v727_v15  ;;  %v705_v41 = vadd.f32 -1.0, %v321_v35  ;;  %v738_v5 = vld [vmem:[%s1041_s7] ss:$0 sm:$0xff] }
   0xd   :  { %v434_v38 = vmul.f32 1e+09, %v704_v33  ;;  %v437_v44 = vmul.f32 1e+09, %v707_v37  ;;  %v739_v16 = vld [vmem:[%s1045_s11] ss:$0 sm:$0xff] }
   0xe   :  { %v435_v48 = vmul.f32 1e+09, %v705_v41 }
   0xf   :  { %440 = vperm.xlu2 %735, %v434_v38  }
  0x12   :  { %186 = vperm.xlu1 %734, %v168_v32  }
  0x14   :  { %176 = vperm.xlu0 %733, %v166_v18  }
  0x17   :  { %445 = vperm.xlu2 %735, %v435_v48  }
  0x19   :  { %661 = vmatmul.msk.bf16.gmra.mxu0 %vm89_vm0, %v718_v6 }
  0x1a   :  { %693 = vmatmul.msk.bf16.gmra.mxu2 %vm89_vm0, %v724_v7  ;;  %455 = vperm.xlu1 %734, %v437_v44  }
  0x1c   :  { %450 = vperm.xlu0 %733, %v436_v24  }
  0x69   :  { %v441_v12 = vpop.permute.xlu2 %440 }
  0x71   :  { %v446_v29 = vpop.permute.xlu2 %445 }
  0x7c   :  { %v182_v18 = vpop.permute.xlu1 %181 }
  0x7e   :  { %v172_v3 = vpop.permute.xlu0 %171 }
  0x84   :  { %v187_v38 = vpop.permute.xlu1 %186 }
  0x86   :  { %v105_v25 = vpop.f32.mrf.mxu0  ;;  %v177_v10 = vpop.permute.xlu0 %176 }
  0x87   :  { %v106_v34 = vadd.f32 %v736_v26, %v105_v25 }
  0x89   :  { %v115_v42 = vmax.f32 %v106_v34, 0.0 }
  0x8d   :  { %v374_v31 = vpop.f32.mrf.mxu2 }
  0x8e   :  { %v107_v36 = vpop.f32.mrf.mxu0  ;;  %v375_v45 = vadd.f32 %v737_v39, %v374_v31 }
  0x8f   :  { %v108_v40 = vadd.f32 %v736_v26, %v107_v36 }
  0x90   :  { %v384_v51 = vmax.f32 %v375_v45, 0.0 }
  0x91   :  { %v116_v43 = vmax.f32 %v108_v40, 0.0 }
  0x93   :  { %v119_v46 = vpack.c.bf16 %v116_v43, %v115_v42 }
  0x95   :  { %v376_v47 = vpop.f32.mrf.mxu2  ;;  %670 = vmatmul.msk.bf16.vlgmr.msra.gmra.mxu1 %vm89_vm0, %v119_v46 }
  0x96   :  { %v377_v49 = vadd.f32 %v737_v39, %v376_v47  ;;  %v110_v50 = vpop.f32.mrf.mxu0 }
  0x97   :  { %v111_v55 = vadd.f32 %v736_v26, %v110_v50 }
  0x98   :  { %v385_v52 = vmax.f32 %v377_v49, 0.0 }
  0x99   :  { %v117_v58 = vmax.f32 %v111_v55, 0.0 }
  0x9a   :  { %v388_v53 = vpack.c.bf16 %v385_v52, %v384_v51 }
  0x9c   :  { %702 = vmatmul.msk.bf16.vlgmr.msra.gmra.mxu3 %vm89_vm0, %v388_v53 }
  0x9d   :  { %v379_v54 = vpop.f32.mrf.mxu2 }
  0x9e   :  { %v112_v56 = vpop.f32.mrf.mxu0  ;;  %v380_v60 = vadd.f32 %v737_v39, %v379_v54 }
  0x9f   :  { %v113_v57 = vadd.f32 %v736_v26, %v112_v56  ;;  %v451_v56 = vpop.permute.xlu0 %450 }
  0xa0   :  { %v386_v0 = vmax.f32 %v380_v60, 0.0 }
  0xa1   :  { %v118_v59 = vmax.f32 %v113_v57, 0.0 }
  0xa3   :  { %v120_v61 = vpack.c.bf16 %v118_v59, %v117_v58 }
  0xa5   :  { %v381_v62 = vpop.f32.mrf.mxu2  ;;  %671 = vmatmul.msk.bf16.gmra.mxu1 %vm89_vm0, %v120_v61 }
  0xa6   :  { %v382_v63 = vadd.f32 %v737_v39, %v381_v62 }
  0xa8   :  { %v387_v1 = vmax.f32 %v382_v63, 0.0 }
  0xaa   :  { %v389_v2 = vpack.c.bf16 %v387_v1, %v386_v0  ;;  %v456_v0 = vpop.permute.xlu1 %455 }
  0xac   :  { %703 = vmatmul.msk.bf16.gmra.mxu3 %vm89_vm0, %v389_v2 }
 0x112   :  { %v151_v4 = vpop.f32.mrf.mxu1 }
 0x113   :  { %v152_v6 = vadd.f32 %v738_v5, %v151_v4 }
 0x115   :  { %v189_v8 = vadd.f32 %v172_v3, %v152_v6 }
 0x117   :  { %v194_v14 = vsel %vm193_vm1, %v189_v8, -inf }
 0x11a   :  { %v153_v7 = vpop.f32.mrf.mxu1 }
 0x11b   :  { %v154_v9 = vadd.f32 %v738_v5, %v153_v7 }
 0x11d   :  { %v190_v11 = vadd.f32 %v177_v10, %v154_v9 }
 0x11f   :  { %v420_v13 = vpop.f32.mrf.mxu3  ;;  %v195_v15 = vsel %vm193_vm1, %v190_v11, -inf }
 0x120   :  { %v196_v17 = vmax.f32 %v194_v14, %v195_v15  ;;  %v421_v21 = vadd.f32 %v739_v16, %v420_v13 }
 0x122   :  { %v197_v19 = vrot.slane %v196_v17, 4  ;;  %v156_v20 = vpop.f32.mrf.mxu1  ;;  %v458_v25 = vadd.f32 %v441_v12, %v421_v21 }
 0x123   :  { %v157_v26 = vadd.f32 %v738_v5, %v156_v20 }
 0x124   :  { %v198_v22 = vmax.f32 %v196_v17, %v197_v19  ;;  %v462_v33 = vsel %vm193_vm1, %v458_v25, -inf }
 0x125   :  { %v191_v34 = vadd.f32 %v182_v18, %v157_v26 }
 0x126   :  { %v199_v23 = vrot.slane %v198_v22, 2 }
 0x127   :  { %v422_v24 = vpop.f32.mrf.mxu3  ;;  %v203_v45 = vsel %vm193_vm1, %v191_v34, -inf }
 0x128   :  { %v423_v27 = vadd.f32 %v739_v16, %v422_v24  ;;  %v200_v28 = vmax.f32 %v198_v22, %v199_v23 }
 0x12a   :  { %v459_v30 = vadd.f32 %v446_v29, %v423_v27  ;;  %v201_v31 = vrot.slane %v200_v28, 1  ;;  %v158_v32 = vpop.f32.mrf.mxu1 }
 0x12b   :  { %v159_v36 = vadd.f32 %v738_v5, %v158_v32 }
 0x12c   :  { %v463_v35 = vsel %vm193_vm1, %v459_v30, -inf  ;;  %v202_v37 = vmax.f32 %v200_v28, %v201_v31 }
 0x12d   :  { %v464_v39 = vmax.f32 %v462_v33, %v463_v35  ;;  %v192_v40 = vadd.f32 %v187_v38, %v159_v36 }
 0x12e   :  { %v212_v41 = vsub.f32 %v189_v8, %v202_v37  ;;  %v213_v42 = vsub.f32 %v190_v11, %v202_v37 }
 0x12f   :  { %v465_v43 = vrot.slane %v464_v39, 4  ;;  %v425_v44 = vpop.f32.mrf.mxu3  ;;  %v204_v46 = vsel %vm193_vm1, %v192_v40, -inf }
 0x130   :  { %v216_v47 = vmul.f32 1.442695, %v212_v41  ;;  %v218_v48 = vmul.f32 1.442695, %v213_v42  ;;  %v205_v50 = vmax.f32 %v203_v45, %v204_v46  ;;  %v426_v53 = vadd.f32 %v739_v16, %v425_v44 }
 0x131   :  { %v466_v49 = vmax.f32 %v464_v39, %v465_v43 }
 0x132   :  { %740 = vpow2.f32 %v216_v47  ;;  %v206_v52 = vrot.slane %v205_v50, 4  ;;  %v460_v60 = vadd.f32 %v451_v56, %v426_v53 }
 0x133   :  { %v467_v51 = vrot.slane %v466_v49, 2  ;;  %742 = vpow2.f32 %v218_v48 }
 0x134   :  { %v207_v55 = vmax.f32 %v205_v50, %v206_v52  ;;  %v471_v10 = vsel %vm193_vm1, %v460_v60, -inf }
 0x135   :  { %v468_v54 = vmax.f32 %v466_v49, %v467_v51 }
 0x136   :  { %v208_v58 = vrot.slane %v207_v55, 2 }
 0x137   :  { %v469_v57 = vrot.slane %v468_v54, 1  ;;  %v427_v59 = vpop.f32.mrf.mxu3 }
 0x138   :  { %v428_v61 = vadd.f32 %v739_v16, %v427_v59  ;;  %v948_v62 = vpop.eup %740  ;;  %v209_v1 = vmax.f32 %v207_v55, %v208_v58 }
 0x139   :  { %v470_v63 = vmax.f32 %v468_v54, %v469_v57  ;;  %v950_v2 = vpop.eup %742  ;;  %v224_v3 = vsel %vm193_vm1, %v948_v62, 0.0 }
 0x13a   :  { %v461_v4 = vadd.f32 %v456_v0, %v428_v61  ;;  %v225_v5 = vsel %vm193_vm1, %v950_v2, 0.0  ;;  %v210_v8 = vrot.slane %v209_v1, 1 }
 0x13b   :  { %v480_v6 = vsub.f32 %v458_v25, %v470_v63  ;;  %v481_v7 = vsub.f32 %v459_v30, %v470_v63  ;;  %v226_v9 = vadd.f32 %v225_v5, %v224_v3 }
 0x13c   :  { %v472_v11 = vsel %vm193_vm1, %v461_v4, -inf  ;;  %v211_v14 = vmax.f32 %v209_v1, %v210_v8 }
 0x13d   :  { %v484_v12 = vmul.f32 1.442695, %v480_v6  ;;  %v486_v13 = vmul.f32 1.442695, %v481_v7  ;;  %v473_v15 = vmax.f32 %v471_v10, %v472_v11  ;;  %v227_v16 = vrot.slane %v226_v9, 4 }
 0x13e   :  { %v214_v17 = vsub.f32 %v191_v34, %v211_v14  ;;  %v215_v18 = vsub.f32 %v192_v40, %v211_v14 }
 0x13f   :  { %744 = vpow2.f32 %v484_v12  ;;  %v474_v19 = vrot.slane %v473_v15, 4  ;;  %v228_v20 = vadd.f32 %v227_v16, %v226_v9 }
 0x140   :  { %746 = vpow2.f32 %v486_v13  ;;  %v220_v21 = vmul.f32 1.442695, %v214_v17  ;;  %v222_v22 = vmul.f32 1.442695, %v215_v18 }
 0x141   :  { %v475_v23 = vmax.f32 %v473_v15, %v474_v19  ;;  %v229_v24 = vrot.slane %v228_v20, 2 }
 0x142   :  { %748 = vpow2.f32 %v222_v22 }
 0x143   :  { %v476_v25 = vrot.slane %v475_v23, 2  ;;  %v230_v26 = vadd.f32 %v229_v24, %v228_v20  ;;  %750 = vpow2.f32 %v220_v21 }
 0x145   :  { %v958_v27 = vpop.eup %744  ;;  %v477_v28 = vmax.f32 %v475_v23, %v476_v25  ;;  %v231_v30 = vrot.slane %v230_v26, 1 }
 0x146   :  { %v960_v29 = vpop.eup %746  ;;  %v492_v31 = vsel %vm193_vm1, %v958_v27, 0.0 }
 0x147   :  { %v493_v32 = vsel %vm193_vm1, %v960_v29, 0.0  ;;  %v478_v33 = vrot.slane %v477_v28, 1  ;;  %v232_v35 = vadd.f32 %v231_v30, %v230_v26 }
 0x148   :  { %v494_v34 = vadd.f32 %v493_v32, %v492_v31  ;;  %v966_v36 = vpop.eup %748 }
 0x149   :  { %v479_v37 = vmax.f32 %v477_v28, %v478_v33  ;;  %v968_v38 = vpop.eup %750  ;;  %752 = vrcp.f32 %v232_v35  ;;  %v234_v40 = vsel %vm193_vm1, %v966_v36, 0.0  ;;  %v253_v56 = vand.u32 2147483648, %v232_v35 }
 0x14a   :  { %v495_v39 = vrot.slane %v494_v34, 4  ;;  %v233_v44 = vsel %vm193_vm1, %v968_v38, 0.0  ;;  %v251_v61 = vand.u32 2147483647, %v232_v35  ;;  %vm247_vm3 = vweird.f32 %v232_v35 }
 0x14b   :  { %v482_v41 = vsub.f32 %v460_v60, %v479_v37  ;;  %v483_v42 = vsub.f32 %v461_v4, %v479_v37  ;;  %v235_v48 = vadd.f32 %v234_v40, %v233_v44  ;;  %v254_v5 = vor.u32 1.1754944e-38, %v253_v56 }
 0x14c   :  { %v496_v43 = vadd.f32 %v495_v39, %v494_v34  ;;  %vm252_vm5 = vcmp.eq.f32.partialorder %v251_v61, 8.507059e+37 }
 0x14d   :  { %v488_v45 = vmul.f32 1.442695, %v482_v41  ;;  %v490_v46 = vmul.f32 1.442695, %v483_v42  ;;  %v236_v51 = vrot.slane %v235_v48, 4 }
 0x14e   :  { %v497_v47 = vrot.slane %v496_v43, 2 }
 0x14f   :  { %754 = vpow2.f32 %v490_v46  ;;  %v753_v49 = vpop.eup %752  ;;  %v237_v54 = vadd.f32 %v236_v51, %v235_v48 }
 0x150   :  { %v498_v50 = vadd.f32 %v497_v47, %v496_v43  ;;  %756 = vpow2.f32 %v488_v45  ;;  %v243_v52 = vmul.f32 %v753_v49, %v232_v35  ;;  %vm248_vm2 = vweird.f32 %v753_v49 }
 0x151   :  { %v238_v58 = vrot.slane %v237_v54, 2  ;;  %vm249_vm4 = vmor %vm247_vm3, %vm248_vm2 }
 0x152   :  { %v499_v53 = vrot.slane %v498_v50, 1  ;;  %v244_v55 = vsub.f32 1.0, %v243_v52 }
 0x153   :  { %v239_v3 = vadd.f32 %v238_v58, %v237_v54 }
 0x154   :  { %v500_v57 = vadd.f32 %v499_v53, %v498_v50  ;;  %v245_v60 = vmul.f32 %v753_v49, %v244_v55 }
 0x155   :  { %v974_v59 = vpop.eup %754  ;;  %v240_v8 = vrot.slane %v239_v3, 1 }
 0x156   :  { %v976_v63 = vpop.eup %756  ;;  %v502_v0 = vsel %vm193_vm1, %v974_v59, 0.0  ;;  %758 = vrcp.f32 %v500_v57  ;;  %v246_v1 = vadd.f32 %v753_v49, %v245_v60  ;;  %v521_v21 = vand.u32 2147483648, %v500_v57 }
 0x157   :  { %v501_v4 = vsel %vm193_vm1, %v976_v63, 0.0  ;;  %v241_v13 = vadd.f32 %v240_v8, %v239_v3  ;;  %v519_v23 = vand.u32 2147483647, %v500_v57  ;;  %vm515_vm7 = vweird.f32 %v500_v57  ;;  %v47_v3 = vld [vmem:[%s1034_s0 + $0x4] sm:$0xff]  }
 0x158   :  { %v503_v6 = vadd.f32 %v502_v0, %v501_v4  ;;  %v250_v7 = vsel %vm249_vm4, %v753_v49, %v246_v1  ;;  %v522_v26 = vor.u32 1.1754944e-38, %v521_v21  ;;  %v46_v4 = vld [vmem:[%s1034_s0] sm:$0xf]  ;;  %v317_v8 = vld [vmem:[%s1036_s2 + $0x4] sm:$0xff]  }
 0x159   :  { %v255_v9 = vsel %vm252_vm5, %v254_v5, %v250_v7  ;;  %760 = vrcp.f32 %v241_v13  ;;  %vm520_vm9 = vcmp.eq.f32.partialorder %v519_v23, 8.507059e+37  ;;  %v265_v37 = vand.u32 2147483647, %v241_v13 }
 0x15a   :  { %v504_v10 = vrot.slane %v503_v6, 4  ;;  %v271_v11 = vmul.f32 %v950_v2, %v255_v9  ;;  %v270_v12 = vmul.f32 %v948_v62, %v255_v9  ;;  %v267_v39 = vand.u32 2147483648, %v241_v13  ;;  %v316_v9 = vld [vmem:[%s1036_s2] sm:$0xf] }
 0x15b   :  { %vm261_vm11 = vweird.f32 %v241_v13  ;;  %vm266_vm13 = vcmp.eq.f32.partialorder %v265_v37, 8.507059e+37  ;;  %v290_v7 = vunpack.c.l.bf16 %v46_v4 }
 0x15c   :  { %v759_v14 = vpop.eup %758  ;;  %v505_v15 = vadd.f32 %v504_v10, %v503_v6  ;;  %v277_v16 = vsel %vm193_vm1, %v271_v11, 0.0  ;;  %v274_v17 = vsel %vm193_vm1, %v270_v12, 0.0  ;;  %v268_v44 = vor.u32 1.1754944e-38, %v267_v39 }
 0x15d   :  { %v511_v18 = vmul.f32 %v759_v14, %v500_v57  ;;  %278 = vadd.xlane.f32.xlu0 %v277_v16  ;;  %275 = vadd.xlane.f32.xlu2 %v274_v17  ;;  %vm516_vm6 = vweird.f32 %v759_v14  ;;  %v559_v10 = vunpack.c.l.bf16 %v317_v8  ;;  %v558_v11 = vunpack.c.l.bf16 %v316_v9 }
 0x15e   :  { %v506_v20 = vrot.slane %v505_v15, 2  ;;  %vm517_vm8 = vmor %vm515_vm7, %vm516_vm6 }
 0x15f   :  { %v512_v19 = vsub.f32 1.0, %v511_v18  ;;  %v761_v25 = vpop.eup %760 }
 0x160   :  { %v507_v2 = vadd.f32 %v506_v20, %v505_v15  ;;  %v257_v30 = vmul.f32 %v761_v25, %v241_v13  ;;  %vm262_vm10 = vweird.f32 %v761_v25 }
 0x161   :  { %v513_v22 = vmul.f32 %v759_v14, %v512_v19  ;;  %vm263_vm12 = vmor %vm261_vm11, %vm262_vm10 }
 0x162   :  { %v508_v62 = vrot.slane %v507_v2, 1  ;;  %v258_v35 = vsub.f32 1.0, %v257_v30 }
 0x163   :  { %v514_v24 = vadd.f32 %v759_v14, %v513_v22  ;;  %v49_v22 = vld [vmem:[%s1034_s0 + $0xc] sm:$0xf] }
 0x164   :  { %v509_v31 = vadd.f32 %v508_v62, %v507_v2  ;;  %v259_v42 = vmul.f32 %v761_v25, %v258_v35 }
 0x165   :  { %v518_v28 = vsel %vm517_vm8, %v759_v14, %v514_v24  ;;  %v729_v24 = vld [vmem:[%s1046_s12] sm:$0xff] }
 0x166   :  { %v523_v32 = vsel %vm520_vm9, %v522_v26, %v518_v28  ;;  %762 = vrcp.f32 %v509_v31  ;;  %v260_v43 = vadd.f32 %v761_v25, %v259_v42  ;;  %v535_v52 = vand.u32 2147483648, %v509_v31 }
 0x167   :  { %v539_v33 = vmul.f32 %v960_v29, %v523_v32  ;;  %v538_v34 = vmul.f32 %v958_v27, %v523_v32  ;;  %v533_v54 = vand.u32 2147483647, %v509_v31  ;;  %vm529_vm15 = vweird.f32 %v509_v31 }
 0x168   :  { %v264_v29 = vsel %vm263_vm12, %v761_v25, %v260_v43  ;;  %v536_v56 = vor.u32 1.1754944e-38, %v535_v52  ;;  %v292_v26 = vunpack.c.h.bf16 %v47_v3  ;;  %v293_v28 = vunpack.c.l.bf16 %v49_v22  ;;  %v319_v43 = vld [vmem:[%s1036_s2 + $0xc] sm:$0xf]  ;;  %s791_s2 = smov [#allocation2]  }
 0x169   :  { %v545_v40 = vsel %vm193_vm1, %v539_v33, 0.0  ;;  %v542_v41 = vsel %vm193_vm1, %v538_v34, 0.0  ;;  %v269_v27 = vsel %vm266_vm13, %v268_v44, %v264_v29  ;;  %vm534_vm3 = vcmp.eq.f32.partialorder %v533_v54, 8.507059e+37  ;;  %s633_s8 = sshll.u32 %s791_s2, 4  ;;  %s634_s8 = int_to_ptr.vmem [resolvable:$true] %s633_s8 }
 0x16a   :  { %546 = vadd.xlane.f32.xlu0 %v545_v40  ;;  %543 = vadd.xlane.f32.xlu2 %v542_v41  ;;  %v272_v47 = vmul.f32 %v968_v38, %v269_v27  ;;  %v273_v48 = vmul.f32 %v966_v36, %v269_v27  ;;  %v560_v27 = vunpack.c.h.bf16 %v317_v8 }
 0x16c   :  { %v763_v45 = vpop.eup %762  ;;  %v280_v50 = vsel %vm193_vm1, %v272_v47, 0.0  ;;  %v283_v51 = vsel %vm193_vm1, %v273_v48, 0.0 }
 0x16d   :  { %v525_v46 = vmul.f32 %v763_v45, %v509_v31  ;;  %281 = vadd.xlane.f32.xlu1 %v280_v50  ;;  %vm530_vm14 = vweird.f32 %v763_v45 }
 0x16e   :  { %vm531_vm2 = vmor %vm529_vm15, %vm530_vm14 }
 0x16f   :  { %v526_v49 = vsub.f32 1.0, %v525_v46  ;;  %v561_v46 = vunpack.c.l.bf16 %v319_v43 }
 0x171   :  { %v527_v53 = vmul.f32 %v763_v45, %v526_v49 }
 0x172   :  { %284 = vadd.xlane.f32.xlu2 %v283_v51 }
 0x173   :  { %v528_v55 = vadd.f32 %v763_v45, %v527_v53 }
 0x175   :  { %v532_v57 = vsel %vm531_vm2, %v763_v45, %v528_v55 }
 0x176   :  { %v537_v38 = vsel %vm534_vm3, %v536_v56, %v532_v57 }
 0x177   :  { %v540_v36 = vmul.f32 %v976_v63, %v537_v38  ;;  %v541_v58 = vmul.f32 %v974_v59, %v537_v38  ;;  %v730_v59 = vld [vmem:[%s1046_s12 + $0x8] sm:$0xff]  ;;  %v291_v63 = vunpack.c.l.bf16 %v47_v3 }
 0x178   :  { %620 = vmatpush.bf16.msrb.mxu0 %v730_v59 }
 0x179   :  { %v548_v60 = vsel %vm193_vm1, %v540_v36, 0.0  ;;  %v551_v61 = vsel %vm193_vm1, %v541_v58, 0.0  ;;  %vm596_vm1 = vcmask 1041409  }
 0x17a   :  { %549 = vadd.xlane.f32.xlu1 %v548_v60  ;;  %552 = vadd.xlane.f32.xlu2 %v551_v61 }
 0x17c   :  { %621 = vmatpush.bf16.msrb.mxu0 %v729_v24 }
 0x1d0   :  { %v279_v0 = vpop.xlane.xlu0 %278  ;;  %v276_v1 = vpop.xlane.xlu2 %275 }
 0x1d1   :  { %v287_v5 = vmul.f32 0.5, %v279_v0  ;;  %v286_v6 = vmul.f32 0.5, %v276_v1 }
 0x1d3   :  { %v295_v12 = vmul.f32 %v291_v63, %v287_v5  ;;  %v294_v13 = vmul.f32 %v290_v7, %v286_v6 }
 0x1d5   :  { %v299_v20 = vsel %vm89_vm0, %v295_v12, 0.0  ;;  %v298_v21 = vsel %vm89_vm0, %v294_v13, 0.0 }
 0x1d6   :  { %v300_v25 = vadd.f32 %v299_v20, %v298_v21 }
 0x1d8   :  { %v301_v35 = vrot.slane %v300_v25, 4 }
 0x1da   :  { %v302_v45 = vadd.f32 %v301_v35, %v300_v25 }
 0x1dc   :  { %v303_v52 = vrot.slane %v302_v45, 2 }
 0x1dd   :  { %v547_v14 = vpop.xlane.xlu0 %546  ;;  %v544_v15 = vpop.xlane.xlu2 %543 }
 0x1de   :  { %v555_v16 = vmul.f32 0.5, %v547_v14  ;;  %v554_v17 = vmul.f32 0.5, %v544_v15  ;;  %v304_v36 = vadd.f32 %v303_v52, %v302_v45 }
 0x1e0   :  { %v563_v18 = vmul.f32 %v559_v10, %v555_v16  ;;  %v562_v19 = vmul.f32 %v558_v11, %v554_v17  ;;  %v282_v30 = vpop.xlane.xlu1 %281  ;;  %v305_v1 = vrot.slane %v304_v36, 1 }
 0x1e1   :  { %v288_v33 = vmul.f32 0.5, %v282_v30 }
 0x1e2   :  { %v567_v23 = vsel %vm89_vm0, %v563_v18, 0.0  ;;  %v566_v2 = vsel %vm89_vm0, %v562_v19, 0.0  ;;  %v306_v5 = vadd.f32 %v305_v1, %v304_v36 }
 0x1e3   :  { %v568_v62 = vadd.f32 %v567_v23, %v566_v2  ;;  %v296_v37 = vmul.f32 %v292_v26, %v288_v33 }
 0x1e5   :  { %v285_v31 = vpop.xlane.xlu2 %284  ;;  %v569_v32 = vrot.slane %v568_v62, 4  ;;  %v307_v41 = vsel %vm89_vm0, %v296_v37, 0.0 }
 0x1e6   :  { %v289_v34 = vmul.f32 0.5, %v285_v31 }
 0x1e7   :  { %v570_v40 = vadd.f32 %v569_v32, %v568_v62 }
 0x1e8   :  { %v297_v39 = vmul.f32 %v293_v28, %v289_v34 }
 0x1e9   :  { %v571_v47 = vrot.slane %v570_v40, 2 }
 0x1ea   :  { %v308_v42 = vsel %vm89_vm0, %v297_v39, 0.0 }
 0x1eb   :  { %v309_v44 = vadd.f32 %v308_v42, %v307_v41  ;;  %v572_v56 = vadd.f32 %v571_v47, %v570_v40 }
 0x1ed   :  { %v310_v29 = vrot.slane %v309_v44, 4  ;;  %v550_v48 = vpop.xlane.xlu1 %549  ;;  %v553_v49 = vpop.xlane.xlu2 %552  ;;  %v573_v61 = vrot.slane %v572_v56, 1 }
 0x1ee   :  { %v556_v50 = vmul.f32 0.5, %v550_v48  ;;  %v557_v51 = vmul.f32 0.5, %v553_v49 }
 0x1ef   :  { %v311_v53 = vadd.f32 %v310_v29, %v309_v44  ;;  %v574_v59 = vadd.f32 %v573_v61, %v572_v56 }
 0x1f0   :  { %v564_v54 = vmul.f32 %v560_v27, %v556_v50  ;;  %v565_v55 = vmul.f32 %v561_v46, %v557_v51 }
 0x1f1   :  { %v312_v58 = vrot.slane %v311_v53, 2  ;;  %v584_v9 = vmul.f32 %v574_v59, %v306_v5 }
 0x1f2   :  { %v575_v57 = vsel %vm89_vm0, %v564_v54, 0.0  ;;  %v576_v38 = vsel %vm89_vm0, %v565_v55, 0.0 }
 0x1f3   :  { %v577_v60 = vadd.f32 %v576_v38, %v575_v57  ;;  %v313_v3 = vadd.f32 %v312_v58, %v311_v53  ;;  %v586_v13 = vpack.c.bf16 %v584_v9, %v584_v9 }
 0x1f5   :  { %v578_v0 = vrot.slane %v577_v60, 4  ;;  %v314_v6 = vrot.slane %v313_v3, 1  ;;  %v594_v15 = vunpack.c.l.b16 %v586_v13 }
 0x1f7   :  { %v579_v4 = vadd.f32 %v578_v0, %v577_v60  ;;  %v315_v10 = vadd.f32 %v314_v6, %v313_v3 }
 0x1f9   :  { %v580_v63 = vrot.slane %v579_v4, 2 }
 0x1fb   :  { %v581_v7 = vadd.f32 %v580_v63, %v579_v4 }
 0x1fd   :  { %v582_v8 = vrot.slane %v581_v7, 1 }
 0x1ff   :  { %v583_v11 = vadd.f32 %v582_v8, %v581_v7 }
 0x201   :  { %v585_v12 = vmul.f32 %v583_v11, %v315_v10 }
 0x203   :  { %v587_v14 = vpack.c.bf16 %v585_v12, %v585_v12 }
 0x205   :  { %v595_v16 = vunpack.c.l.b16 %v587_v14 }
 0x207   :  { %v597_v17 = vsel %vm596_vm1, %v595_v16, %v594_v15 }
 0x208   :  { %v598_v18 = vpack.c.b16 %v597_v17, %v597_v17 }
 0x20a   :  { %716 = vmatmul.msk.bf16.vlgmr.msrb.gmra.mxu0 %vm89_vm0, %v598_v18 }
 0x287   :  { %v623_v19 = vpop.f32.mrf.mxu0 }
 0x288   :  { %627 = vst [vmem:[#allocation2] sm:$0x3] %v623_v19 }
 0x289   :  { %638 = dma.vmem_to_hbm [thread:$0]  %s634_s8, 32, %s636_s23, [#allocation3]  }
 0x28f   :  { %v625_v20 = vpop.f32.mrf.mxu0 }
 0x290   :  { %788 = dma.done.wait [#allocation3], 32  }
 0x291   :  { %789 = vsyncadd [#allocation3], 4294967264 }
 0x292   :  { %643 = vsyncpa [#allocation3], 1 }

</bundles_post_ra>
